<compile_context>
chip_gen: v5e
topology: v5e:2x2
jax: 0.10.0
libtpu: 0.0.40
codegen_flags: <defaults>
</compile_context>

<pallas_src>
import functools

import jax
import jax.numpy as jnp
from jax.experimental import pallas as pl
from jax.experimental.pallas import tpu as pltpu


def _grad_loss_kernel(pred_ref, target_ref, out_dx_ref, out_dy_ref,
                      acc_dx_ref, acc_dy_ref, *, total_slabs, img_w):
    c = pl.program_id(0)           # per-split ("parallel") axis
    i = pl.program_id(1)           # accumulation ("arbitrary") axis
    steps = pl.num_programs(1)
    gb, hw = pred_ref.shape        # slabs per block, flattened H*W

    @pl.when(i == 0)
    def _init():
        acc_dx_ref[...] = jnp.zeros_like(acc_dx_ref)
        acc_dy_ref[...] = jnp.zeros_like(acc_dy_ref)

    # Flattened forward differences via lane rolls (XLU slot):
    # position j receives d[j+1] (dx) / d[j+W] (dy); the wrap/seam columns
    # are excluded once in the wrapper, never per element here.
    d = (pred_ref[...] - target_ref[...]).astype(jnp.float32)
    adx = jnp.abs(pltpu.roll(d, shift=hw - 1, axis=1) - d)
    ady = jnp.abs(pltpu.roll(d, shift=hw - img_w, axis=1) - d)

    blk = c * steps + i                     # logical block id (may overhang)
    valid = total_slabs - blk * gb          # #real slabs in this block

    @pl.when(valid >= gb)                   # hot path: no selects at all
    def _accum_full():
        acc_dx_ref[...] += adx
        acc_dy_ref[...] += ady

    @pl.when(valid < gb)                    # last / overhang block only
    def _accum_partial():
        rows = jax.lax.broadcasted_iota(jnp.int32, (gb, hw), 0)
        keep = rows < valid
        acc_dx_ref[...] += jnp.where(keep, adx, 0.0)
        acc_dy_ref[...] += jnp.where(keep, ady, 0.0)

    # One cross-sublane reduction per split, on the last step only.
    # Output stays lane-dense (full HW columns); wrap columns are dropped
    # by the wrapper.
    @pl.when(i == steps - 1)
    def _finalize():
        out_dx_ref[...] = jnp.sum(acc_dx_ref[...], axis=0, keepdims=True)
        out_dy_ref[...] = jnp.sum(acc_dy_ref[...], axis=0, keepdims=True)


def _device_knobs():
    """(num_splits, vmem usage budget, vmem limit) per TPU generation."""
    try:
        kind = jax.devices()[0].device_kind.lower()
    except Exception:
        kind = ""
    num_splits = 2 if "v7" in kind else 1
    if ("v5" in kind) or ("v6" in kind):
        # 128 MiB physical VMEM: go big to amortize per-step overhead.
        return num_splits, 72 * 2**20, 100 * 2**20
    # v7x (64 MiB physical VMEM) and unknown chips: stay conservative.
    return num_splits, 36 * 2**20, 48 * 2**20


def gradient_loss(pred, target):
    """Pallas implementation of GradientLoss.forward(pred, target)."""
    assert pred.shape == target.shape and pred.ndim == 4
    B, C, H, W = pred.shape
    G = B * C
    HW = H * W

    p = pred.reshape(G, HW)      # free reshape: contiguous, lane-dense rows
    t = target.reshape(G, HW)

    num_splits, usage_budget, vmem_limit = _device_knobs()

    # Block sizing from the *padded* VMEM footprint (lanes round to 128):
    # 2 inputs x 2 pipeline buffers + 2 f32 accumulators, per slab row.
    itemsize = jnp.dtype(pred.dtype).itemsize
    padded_w = pl.cdiv(HW, 128) * 128
    bytes_per_row = 4 * padded_w * itemsize + 2 * padded_w * 4
    gb = max(1, usage_budget // bytes_per_row)
    gb = min(gb, pl.cdiv(G, num_splits))
    if gb >= G:
        gb = G                      # one block covers everything (full dim)
    elif gb >= 8:
        gb -= gb % 8                # keep the sublane dim 8-aligned
    else:
        gb = min(8, G)              # tiny budget: accept 8-row blocks

    num_blocks = pl.cdiv(G, gb)
    steps = pl.cdiv(num_blocks, num_splits)
    last_blk = num_blocks - 1

    kernel = functools.partial(_grad_loss_kernel, total_slabs=G, img_w=W)

    in_map = lambda c, i: (jnp.minimum(c * steps + i, last_blk), 0)
    out_map = lambda c, i: (c, 0)

    part_dx, part_dy = pl.pallas_call(
        kernel,
        out_shape=(
            jax.ShapeDtypeStruct((num_splits, HW), jnp.float32),
            jax.ShapeDtypeStruct((num_splits, HW), jnp.float32),
        ),
        grid_spec=pltpu.PrefetchScalarGridSpec(
            num_scalar_prefetch=0,
            grid=(num_splits, steps),
            in_specs=[
                pl.BlockSpec((gb, HW), in_map),
                pl.BlockSpec((gb, HW), in_map),
            ],
            out_specs=[
                pl.BlockSpec((1, HW), out_map),
                pl.BlockSpec((1, HW), out_map),
            ],
            scratch_shapes=[
                pltpu.VMEM((gb, HW), jnp.float32),
                pltpu.VMEM((gb, HW), jnp.float32),
            ],
        ),
        compiler_params=pltpu.CompilerParams(
            dimension_semantics=("parallel", "arbitrary"),
            vmem_limit_bytes=vmem_limit,
        ),
    )(p, t)

    # One-time wrap/seam exclusion on the tiny per-column partial sums.
    col = jnp.arange(HW, dtype=jnp.int32)
    dx_valid = (col % W) != (W - 1)     # drop per-image-row wrap column
    dy_valid = col < (HW - W)           # drop last image row (wrap)
    sum_dx = jnp.sum(jnp.where(dx_valid, part_dx, 0.0))
    sum_dy = jnp.sum(jnp.where(dy_valid, part_dy, 0.0))

    n_dx = G * H * (W - 1)
    n_dy = G * (H - 1) * W
    # W == 1 / H == 1 -> 0/0 = NaN, matching torch's mean over empty tensors.
    return sum_dx / jnp.float32(n_dx) + sum_dy / jnp.float32(n_dy)


def _reference_loss(pred, target):
    """Pure-JAX reference for sanity checking."""
    pdx = pred[..., :, 1:] - pred[..., :, :-1]
    pdy = pred[..., 1:, :] - pred[..., :-1, :]
    tdx = target[..., :, 1:] - target[..., :, :-1]
    tdy = target[..., 1:, :] - target[..., :-1, :]
    return jnp.mean(jnp.abs(pdx - tdx)) + jnp.mean(jnp.abs(pdy - tdy))


if __name__ == "__main__":
    key = jax.random.PRNGKey(0)
    k1, k2 = jax.random.split(key)
    B, C, H, W = 2, 4, 16, 16  # NCHW
    pred = jax.random.normal(k1, (B, C, H, W), dtype=jnp.float32)
    target = jax.random.normal(k2, (B, C, H, W), dtype=jnp.float32)

    loss = jax.block_until_ready(jax.jit(gradient_loss)(pred, target))
    ref = jax.block_until_ready(_reference_loss(pred, target))

    assert jnp.allclose(loss, ref, rtol=1e-5, atol=1e-5), (loss, ref)
    print("KERNEL_OK")
</pallas_src>

<mosaic_0001>
module attributes {stable_mosaic.version = 11 : i64} {
  func.func @_grad_loss_kernel(%arg0: i32, %arg1: i32, %arg2: memref<8x256xf32, #tpu.memory_space<vmem>>, %arg3: memref<8x256xf32, #tpu.memory_space<vmem>>, %arg4: memref<1x256xf32, #tpu.memory_space<vmem>>, %arg5: memref<1x256xf32, #tpu.memory_space<vmem>>, %arg6: memref<8x256xf32, #tpu.memory_space<vmem>>, %arg7: memref<8x256xf32, #tpu.memory_space<vmem>>) attributes {dimension_semantics = [#tpu.dimension_semantics<parallel>, #tpu.dimension_semantics<arbitrary>], iteration_bounds = array<i64: 1, 1>, scalar_prefetch = 0 : i64, scratch_operands = 2 : i64, tpu.core_type = #tpu.core_type<tc>, window_params = [{transform_indices = @transform_0, window_bounds = array<i64: 8, 256>}, {transform_indices = @transform_1, window_bounds = array<i64: 8, 256>}, {transform_indices = @transform_2, window_bounds = array<i64: 1, 256>}, {transform_indices = @transform_3, window_bounds = array<i64: 1, 256>}]} {
    %c0_i32 = arith.constant 0 : i32
    %0 = arith.cmpi eq, %arg1, %c0_i32 : i32
    %1 = arith.extui %0 : i1 to i32
    %c0_i32_0 = arith.constant 0 : i32
    %2 = arith.cmpi ne, %1, %c0_i32_0 : i32
    scf.if %2 {
      %cst = arith.constant 0.000000e+00 : f32
      %25 = vector.broadcast %cst : f32 to vector<8x256xf32>
      %c0_11 = arith.constant 0 : index
      %c0_12 = arith.constant 0 : index
      %26 = vector.load %arg6[%c0_11, %c0_12] : memref<8x256xf32, #tpu.memory_space<vmem>>, vector<8x256xf32>
      tpu.vector_store %arg6[%c0_11, %c0_12], %25 {strides = array<i32>} : memref<8x256xf32, #tpu.memory_space<vmem>>, vector<8x256xf32>,
      %cst_13 = arith.constant 0.000000e+00 : f32
      %27 = vector.broadcast %cst_13 : f32 to vector<8x256xf32>
      %c0_14 = arith.constant 0 : index
      %c0_15 = arith.constant 0 : index
      %28 = vector.load %arg7[%c0_14, %c0_15] : memref<8x256xf32, #tpu.memory_space<vmem>>, vector<8x256xf32>
      tpu.vector_store %arg7[%c0_14, %c0_15], %27 {strides = array<i32>} : memref<8x256xf32, #tpu.memory_space<vmem>>, vector<8x256xf32>,
    } else {
    }
    %c0 = arith.constant 0 : index
    %c0_1 = arith.constant 0 : index
    %3 = vector.load %arg2[%c0, %c0_1] : memref<8x256xf32, #tpu.memory_space<vmem>>, vector<8x256xf32>
    %c0_2 = arith.constant 0 : index
    %c0_3 = arith.constant 0 : index
    %4 = vector.load %arg3[%c0_2, %c0_3] : memref<8x256xf32, #tpu.memory_space<vmem>>, vector<8x256xf32>
    %5 = arith.subf %3, %4 : vector<8x256xf32>
    %c255_i32 = arith.constant 255 : i32
    %6 = tpu.dynamic_rotate %5 by %c255_i32 dim 1 : vector<8x256xf32>, i32 -> vector<8x256xf32>
    %7 = arith.subf %6, %5 : vector<8x256xf32>
    %8 = math.absf %7 : vector<8x256xf32>
    %c240_i32 = arith.constant 240 : i32
    %9 = tpu.dynamic_rotate %5 by %c240_i32 dim 1 : vector<8x256xf32>, i32 -> vector<8x256xf32>
    %10 = arith.subf %9, %5 : vector<8x256xf32>
    %11 = math.absf %10 : vector<8x256xf32>
    %c1_i32 = arith.constant 1 : i32
    %12 = arith.muli %arg0, %c1_i32 : i32
    %13 = arith.addi %12, %arg1 : i32
    %c8_i32 = arith.constant 8 : i32
    %14 = arith.muli %13, %c8_i32 : i32
    %c8_i32_4 = arith.constant 8 : i32
    %15 = arith.subi %c8_i32_4, %14 : i32
    %c8_i32_5 = arith.constant 8 : i32
    %16 = arith.cmpi sge, %15, %c8_i32_5 : i32
    %17 = arith.extui %16 : i1 to i32
    %c0_i32_6 = arith.constant 0 : i32
    %18 = arith.cmpi ne, %17, %c0_i32_6 : i32
    scf.if %18 {
      %c0_11 = arith.constant 0 : index
      %c0_12 = arith.constant 0 : index
      %25 = vector.load %arg6[%c0_11, %c0_12] : memref<8x256xf32, #tpu.memory_space<vmem>>, vector<8x256xf32>
      %26 = arith.addf %25, %8 : vector<8x256xf32>
      %c0_13 = arith.constant 0 : index
      %c0_14 = arith.constant 0 : index
      %27 = vector.load %arg6[%c0_13, %c0_14] : memref<8x256xf32, #tpu.memory_space<vmem>>, vector<8x256xf32>
      tpu.vector_store %arg6[%c0_13, %c0_14], %26 {strides = array<i32>} : memref<8x256xf32, #tpu.memory_space<vmem>>, vector<8x256xf32>,
      %c0_15 = arith.constant 0 : index
      %c0_16 = arith.constant 0 : index
      %28 = vector.load %arg7[%c0_15, %c0_16] : memref<8x256xf32, #tpu.memory_space<vmem>>, vector<8x256xf32>
      %29 = arith.addf %28, %11 : vector<8x256xf32>
      %c0_17 = arith.constant 0 : index
      %c0_18 = arith.constant 0 : index
      %30 = vector.load %arg7[%c0_17, %c0_18] : memref<8x256xf32, #tpu.memory_space<vmem>>, vector<8x256xf32>
      tpu.vector_store %arg7[%c0_17, %c0_18], %29 {strides = array<i32>} : memref<8x256xf32, #tpu.memory_space<vmem>>, vector<8x256xf32>,
    } else {
    }
    %c8_i32_7 = arith.constant 8 : i32
    %19 = arith.cmpi slt, %15, %c8_i32_7 : i32
    %20 = arith.extui %19 : i1 to i32
    %c0_i32_8 = arith.constant 0 : i32
    %21 = arith.cmpi ne, %20, %c0_i32_8 : i32
    scf.if %21 {
      %25 = tpu.iota {dimensions = array<i32: 0>} : vector<8x256xi32>
      %26 = vector.broadcast %15 : i32 to vector<8x256xi32>
      %27 = arith.cmpi slt, %25, %26 : vector<8x256xi32>
      %c0_11 = arith.constant 0 : index
      %c0_12 = arith.constant 0 : index
      %28 = vector.load %arg6[%c0_11, %c0_12] : memref<8x256xf32, #tpu.memory_space<vmem>>, vector<8x256xf32>
      %cst = arith.constant 0.000000e+00 : f32
      %29 = vector.broadcast %cst : f32 to vector<8x256xf32>
      %30 = arith.select %27, %8, %29 : vector<8x256xi1>, vector<8x256xf32>
      %31 = arith.addf %28, %30 : vector<8x256xf32>
      %c0_13 = arith.constant 0 : index
      %c0_14 = arith.constant 0 : index
      %32 = vector.load %arg6[%c0_13, %c0_14] : memref<8x256xf32, #tpu.memory_space<vmem>>, vector<8x256xf32>
      tpu.vector_store %arg6[%c0_13, %c0_14], %31 {strides = array<i32>} : memref<8x256xf32, #tpu.memory_space<vmem>>, vector<8x256xf32>,
      %c0_15 = arith.constant 0 : index
      %c0_16 = arith.constant 0 : index
      %33 = vector.load %arg7[%c0_15, %c0_16] : memref<8x256xf32, #tpu.memory_space<vmem>>, vector<8x256xf32>
      %cst_17 = arith.constant 0.000000e+00 : f32
      %34 = vector.broadcast %cst_17 : f32 to vector<8x256xf32>
      %35 = arith.select %27, %11, %34 : vector<8x256xi1>, vector<8x256xf32>
      %36 = arith.addf %33, %35 : vector<8x256xf32>
      %c0_18 = arith.constant 0 : index
      %c0_19 = arith.constant 0 : index
      %37 = vector.load %arg7[%c0_18, %c0_19] : memref<8x256xf32, #tpu.memory_space<vmem>>, vector<8x256xf32>
      tpu.vector_store %arg7[%c0_18, %c0_19], %36 {strides = array<i32>} : memref<8x256xf32, #tpu.memory_space<vmem>>, vector<8x256xf32>,
    } else {
    }
    %c0_i32_9 = arith.constant 0 : i32
    %22 = arith.cmpi eq, %arg1, %c0_i32_9 : i32
    %23 = arith.extui %22 : i1 to i32
    %c0_i32_10 = arith.constant 0 : i32
    %24 = arith.cmpi ne, %23, %c0_i32_10 : i32
    scf.if %24 {
      %c0_11 = arith.constant 0 : index
      %c0_12 = arith.constant 0 : index
      %25 = vector.load %arg6[%c0_11, %c0_12] : memref<8x256xf32, #tpu.memory_space<vmem>>, vector<8x256xf32>
      %cst = arith.constant dense<0.000000e+00> : vector<256xf32>
      %26 = vector.multi_reduction <add>, %25, %cst [0] : vector<8x256xf32> to vector<256xf32>
      %27 = vector.shape_cast %26 : vector<256xf32> to vector<1x256xf32>
      %c0_13 = arith.constant 0 : index
      %c0_14 = arith.constant 0 : index
      %28 = vector.load %arg4[%c0_13, %c0_14] : memref<1x256xf32, #tpu.memory_space<vmem>>, vector<1x256xf32>
      tpu.vector_store %arg4[%c0_13, %c0_14], %27 {strides = array<i32>} : memref<1x256xf32, #tpu.memory_space<vmem>>, vector<1x256xf32>,
      %c0_15 = arith.constant 0 : index
      %c0_16 = arith.constant 0 : index
      %29 = vector.load %arg7[%c0_15, %c0_16] : memref<8x256xf32, #tpu.memory_space<vmem>>, vector<8x256xf32>
      %cst_17 = arith.constant dense<0.000000e+00> : vector<256xf32>
      %30 = vector.multi_reduction <add>, %29, %cst_17 [0] : vector<8x256xf32> to vector<256xf32>
      %31 = vector.shape_cast %30 : vector<256xf32> to vector<1x256xf32>
      %c0_18 = arith.constant 0 : index
      %c0_19 = arith.constant 0 : index
      %32 = vector.load %arg5[%c0_18, %c0_19] : memref<1x256xf32, #tpu.memory_space<vmem>>, vector<1x256xf32>
      tpu.vector_store %arg5[%c0_18, %c0_19], %31 {strides = array<i32>} : memref<1x256xf32, #tpu.memory_space<vmem>>, vector<1x256xf32>,
    } else {
    }
    return
  }
  func.func @transform_0(%arg0: i32, %arg1: i32) -> (i32, i32) {
    %c1_i32 = arith.constant 1 : i32
    %0 = arith.muli %arg0, %c1_i32 : i32
    %1 = arith.addi %0, %arg1 : i32
    %c0_i32 = arith.constant 0 : i32
    %2 = arith.minsi %1, %c0_i32 : i32
    %c0_i32_0 = arith.constant 0 : i32
    %c0_i32_1 = arith.constant 0 : i32
    return %2, %c0_i32_0 : i32, i32
  }
  func.func @transform_1(%arg0: i32, %arg1: i32) -> (i32, i32) {
    %c1_i32 = arith.constant 1 : i32
    %0 = arith.muli %arg0, %c1_i32 : i32
    %1 = arith.addi %0, %arg1 : i32
    %c0_i32 = arith.constant 0 : i32
    %2 = arith.minsi %1, %c0_i32 : i32
    %c0_i32_0 = arith.constant 0 : i32
    %c0_i32_1 = arith.constant 0 : i32
    return %2, %c0_i32_0 : i32, i32
  }
  func.func @transform_2(%arg0: i32, %arg1: i32) -> (i32, i32) {
    %c0_i32 = arith.constant 0 : i32
    %c0_i32_0 = arith.constant 0 : i32
    return %arg0, %c0_i32 : i32, i32
  }
  func.func @transform_3(%arg0: i32, %arg1: i32) -> (i32, i32) {
    %c0_i32 = arith.constant 0 : i32
    %c0_i32_0 = arith.constant 0 : i32
    return %arg0, %c0_i32 : i32, i32
  }
}

</mosaic_0001>

<bundles_post_ra>
// kernel: gradient_loss.1
= control target key start
LH: loop header
LB: loop body
LE: loop exit
PB: predicated region body
PF: predicated region fallthrough
CT: control target
= control target key end

     0   :  { %s224_s16 = smov 112   ;;  %s225_s17 = smov 127   ;;  %v91_v6 = vlaneseq  ;;  %vm174_vm2 = vcmask 1040384   ;;  %s264_s0 = inlined_call_operand.vmem [shape: f32[8,256], index: 0, kind: input, shape index: {}]   ;;  %s265_s1 = inlined_call_operand.vmem [shape: f32[8,256], index: 1, kind: input, shape index: {}]   ;;  %s266_s3 = inlined_call_operand.vmem [shape: f32[1,256], index: 3, kind: output, shape index: {1}]   ;;  %s267_s2 = inlined_call_operand.vmem [shape: f32[1,256], index: 2, kind: output, shape index: {0}]  }
   0x1   :  { %v81_v0 = vld [vmem:[%s264_s0] sm:$0xff]  ;;  %v82_v3 = vld [vmem:[%s264_s0 + $0x8] sm:$0xff] }
   0x2   :  { %v83_v1 = vld [vmem:[%s265_s1] sm:$0xff]  ;;  %v84_v4 = vld [vmem:[%s265_s1 + $0x8] sm:$0xff]  ;;  %v92_v9 = vand.u32 127, %v91_v6  ;;  %vm179_vm3 = vcmp.lt.s32.totalorder %v91_v6, 256 }
   0x3   :  { %v85_v2 = vsub.f32 %v81_v0, %v83_v1  ;;  %v86_v5 = vsub.f32 %v82_v3, %v84_v4 }
   0x4   :  { %vm104_vm0 = vcmp.lt.s32.totalorder %v92_v9, 112  ;;  %vm93_vm1 = vcmp.lt.s32.totalorder %v92_v9, 127 }
   0x5   :  { %100 = vrot.lane.b32.xlu1 %v85_v2, %s224_s16  ;;  %87 = vrot.lane.b32.xlu0 %v85_v2, %s225_s17 }
   0xd   :  { %102 = vrot.lane.b32.xlu1 %v86_v5, %s224_s16  ;;  %89 = vrot.lane.b32.xlu0 %v86_v5, %s225_s17 }
  0x77   :  { %v101_v7 = vpop.permute.xlu1 %100  ;;  %v88_v8 = vpop.permute.xlu0 %87 }
  0x7f   :  { %v103_v10 = vpop.permute.xlu1 %102  ;;  %v90_v11 = vpop.permute.xlu0 %89 }
  0x80   :  { %v105_v12 = vsel %vm104_vm0, %v101_v7, %v103_v10  ;;  %v106_v13 = vsel %vm104_vm0, %v103_v10, %v101_v7  ;;  %v94_v14 = vsel %vm93_vm1, %v88_v8, %v90_v11  ;;  %v95_v15 = vsel %vm93_vm1, %v90_v11, %v88_v8 }
  0x81   :  { %v107_v16 = vsub.f32 %v105_v12, %v85_v2  ;;  %v108_v17 = vsub.f32 %v106_v13, %v86_v5  ;;  %v96_v18 = vsub.f32 %v94_v14, %v85_v2  ;;  %v97_v19 = vsub.f32 %v95_v15, %v86_v5 }
  0x83   :  { %v109_v20 = vand.u32 2147483647, %v107_v16  ;;  %v110_v21 = vand.u32 2147483647, %v108_v17  ;;  %v98_v22 = vand.u32 2147483647, %v96_v18 }
  0x84   :  { %v99_v23 = vand.u32 2147483647, %v97_v19 }
  0x85   :  { %v184_v24 = vrot.slane %v109_v20, 4  ;;  %v190_v25 = vrot.slane %v110_v21, 4  ;;  %v159_v26 = vrot.slane %v98_v22, 4 }
  0x86   :  { %v165_v27 = vrot.slane %v99_v23, 4 }
  0x87   :  { %v185_v28 = vadd.f32 %v184_v24, %v109_v20  ;;  %v191_v29 = vadd.f32 %v190_v25, %v110_v21  ;;  %v160_v30 = vadd.f32 %v159_v26, %v98_v22 }
  0x88   :  { %v166_v31 = vadd.f32 %v165_v27, %v99_v23 }
  0x89   :  { %v186_v32 = vrot.slane %v185_v28, 2  ;;  %v192_v33 = vrot.slane %v191_v29, 2  ;;  %v161_v34 = vrot.slane %v160_v30, 2 }
  0x8a   :  { %v167_v35 = vrot.slane %v166_v31, 2 }
  0x8b   :  { %v187_v36 = vadd.f32 %v186_v32, %v185_v28  ;;  %v193_v37 = vadd.f32 %v192_v33, %v191_v29  ;;  %v162_v38 = vadd.f32 %v161_v34, %v160_v30 }
  0x8c   :  { %v168_v39 = vadd.f32 %v167_v35, %v166_v31 }
  0x8d   :  { %v188_v40 = vrot.slane %v187_v36, 1  ;;  %v194_v41 = vrot.slane %v193_v37, 1  ;;  %v163_v42 = vrot.slane %v162_v38, 1 }
  0x8e   :  { %v169_v43 = vrot.slane %v168_v39, 1 }
  0x8f   :  { %v195_v44 = vadd.f32 %v194_v41, %v193_v37  ;;  %v189_v46 = vadd.f32 %v188_v40, %v187_v36  ;;  %v164_v48 = vadd.f32 %v163_v42, %v162_v38 }
  0x90   :  { %v170_v45 = vadd.f32 %v169_v43, %v168_v39 }
  0x91   :  { %v198_v47 = vrot.slane %v195_v44, 7 }
  0x92   :  { %v173_v49 = vrot.slane %v170_v45, 7 }
  0x93   :  { %v199_v50 = vsel %vm174_vm2, %v189_v46, %v198_v47 }
  0x94   :  { %201 = vst.msk [vmem:[%s266_s3] sm:$0x3] %vm179_vm3, %v199_v50  ;;  %v175_v51 = vsel %vm174_vm2, %v164_v48, %v173_v49 }
  0x95   :  { %181 = vst.msk [vmem:[%s267_s2] sm:$0x3] %vm179_vm3, %v175_v51 }

</bundles_post_ra>
